<compile_context>
chip_gen: v7x
topology: tpu7x:2x2x1
jax: 0.10.0
libtpu: 0.0.40
codegen_flags: <defaults>
</compile_context>

<pallas_src>
import jax
import jax.numpy as jnp
from jax.experimental import pallas as pl
from jax.experimental.pallas import tpu as pltpu

_LANE = 128      # TPU lane width
_SUBLANE = 8     # TPU sublane width

# Only bother single-buffering constant weight blocks once they are big
# enough for the 2x reservation to matter (v7x has 64 MiB VMEM / TC).
_SINGLE_BUFFER_WEIGHT_BYTES = 2 << 20
# Keep double-buffered activation tiles v5e-friendly (16 MiB scoped default).
_ACT_TILE_BUDGET_BYTES = 12 << 20


def _round_up(n, m):
    return ((n + m - 1) // m) * m


def _pick_row_tile(m, bytes_per_row, pref=1024):
    """Row-block size: large (pref), >=2 grid steps when possible, VMEM-capped."""
    if m <= _SUBLANE:
        return _SUBLANE
    # At least two grid steps so both v7x TensorCores get work.
    tm = min(pref, _round_up(pl.cdiv(m, 2), _SUBLANE))
    # Cap so double-buffered activation tiles stay within a v5e-safe budget.
    while tm > _SUBLANE and 2 * tm * bytes_per_row > _ACT_TILE_BUDGET_BYTES:
        tm = _round_up(max(_SUBLANE, tm // 2), _SUBLANE)
    return tm


def _fused_mlp_kernel(x_ref, *refs):
    """One (tm, Npad) output row-block: runs the whole MLP.

    refs = (w0, b0, w1, b1, ..., o_ref).  Weights are (Kpad_l, Npad_l)
    pre-transposed, lane-padded, bf16; biases are (1, Npad_l) f32.  The
    intermediate activation never touches HBM.
    """
    o_ref = refs[-1]
    wb = refs[:-1]
    num_layers = len(wb) // 2

    h = x_ref[...].astype(jnp.float32)
    for l in range(num_layers):
        w = wb[2 * l][...]                      # bf16 (Kpad, Npad)
        b = wb[2 * l + 1][...]                  # f32  (1, Npad)
        y = jnp.dot(h.astype(jnp.bfloat16), w,
                    preferred_element_type=jnp.float32) + b
        h = jnp.maximum(y, 0.0)                 # ReLU after EVERY layer (incl. last)
    o_ref[...] = h.astype(o_ref.dtype)


@jax.jit
def fused_mlp(x, wts, bs):
    """relu(...relu(x @ wts[0] + bs[0])... @ wts[-1] + bs[-1]).

    x      : (M, K0) f32
    wts[l] : (Kpad_l, Npad_l) pre-transposed, zero lane-padded bf16 weights
    bs[l]  : (1, Npad_l) zero-padded f32 biases
    Returns (M, Npad_last); caller slices to the true output width if needed.
    """
    M, K0 = x.shape
    out_pad = wts[-1].shape[1]
    max_hidden = max(w.shape[1] for w in wts)

    bytes_per_row = (K0 * x.dtype.itemsize) + (out_pad + max_hidden) * 4
    tm = _pick_row_tile(M, bytes_per_row)
    grid = (pl.cdiv(M, tm),)

    # Constant-index, full-array weight/bias blocks: fetched once, VMEM-resident.
    w_bytes = sum(int(w.size) * w.dtype.itemsize for w in wts)
    b_bytes = sum(int(b.size) * b.dtype.itemsize for b in bs)
    single_buffer_weights = w_bytes > _SINGLE_BUFFER_WEIGHT_BYTES

    def _const_spec(shape):
        if single_buffer_weights:
            return pl.BlockSpec(shape, lambda i: (0, 0),
                                pipeline_mode=pl.Buffered(1))
        return pl.BlockSpec(shape, lambda i: (0, 0))

    in_specs = [pl.BlockSpec((tm, K0), lambda i: (i, 0))]
    args = [x]
    for w, b in zip(wts, bs):
        in_specs.append(_const_spec(w.shape))
        in_specs.append(_const_spec(b.shape))
        args.append(w)
        args.append(b)

    # VMEM accounting: double-buffered x/out tiles + resident weights + slack
    # for in-kernel intermediates.
    wbuf = 1 if single_buffer_weights else 2
    est = (2 * tm * K0 * x.dtype.itemsize
           + 2 * tm * out_pad * 4
           + wbuf * (w_bytes + b_bytes)
           + 2 * tm * max_hidden * 4)
    vmem_limit = int(min(48 << 20, max(8 << 20, 2 * est)))

    flops = 2 * M * sum(w.shape[0] * w.shape[1] for w in wts)
    bytes_accessed = (int(x.size) * x.dtype.itemsize + w_bytes + b_bytes
                      + M * out_pad * 4)

    return pl.pallas_call(
        _fused_mlp_kernel,
        out_shape=jax.ShapeDtypeStruct((M, out_pad), jnp.float32),
        grid_spec=pltpu.PrefetchScalarGridSpec(
            num_scalar_prefetch=0,
            grid=grid,
            in_specs=in_specs,
            out_specs=pl.BlockSpec((tm, out_pad), lambda i: (i, 0)),
        ),
        compiler_params=pltpu.CompilerParams(
            dimension_semantics=("parallel",),
            vmem_limit_bytes=vmem_limit,
        ),
        cost_estimate=pl.CostEstimate(
            flops=flops, transcendentals=0, bytes_accessed=bytes_accessed),
    )(*args)


class MLP1D:
    """JAX/Pallas port of mlp1D: Sequential([Linear, ReLU] * num_layers)."""

    def __init__(self, key, num_layers=2, in_channels=64, h_channels=128,
                 out_channels=64):
        self.params = []     # PyTorch-layout (out, in) f32 weights + (out,) biases
        self._wts = []       # kernel layout: (in_pad, out_pad) transposed, bf16
        self._bs = []        # kernel layout: (1, out_pad) f32
        self.out_channels = out_channels

        in_dim = in_channels
        in_pad = in_channels   # padded input width seen by the kernel's layer l
        for i in range(num_layers):
            out_dim = h_channels if i < num_layers - 1 else out_channels
            key, kw = jax.random.split(key)
            # Deterministic kaiming-like init (fan_in, relu gain).
            std = (2.0 / in_dim) ** 0.5
            w = std * jax.random.normal(kw, (out_dim, in_dim), jnp.float32)
            b = jnp.zeros((out_dim,), jnp.float32)
            self.params.append((w, b))

            # Pre-transpose + zero-pad the lane (output) dim to a multiple of
            # 128 so every in-kernel store is lane-dense (no masked vst).
            # Weights are bf16 (f32 accumulation happens in the kernel).
            out_pad = _round_up(out_dim, _LANE)
            wt = jnp.zeros((in_pad, out_pad), jnp.bfloat16)
            wt = wt.at[:in_dim, :out_dim].set(w.T.astype(jnp.bfloat16))
            bp = jnp.zeros((1, out_pad), jnp.float32)
            bp = bp.at[:, :out_dim].set(b)
            self._wts.append(wt)
            self._bs.append(bp)

            in_dim = out_dim
            in_pad = out_pad

    def __call__(self, x, return_padded=False):
        # x: (..., in_channels) — flatten leading dims into M like nn.Linear.
        lead = x.shape[:-1]
        h = x.reshape(-1, x.shape[-1])
        y = fused_mlp(h, self._wts, self._bs)
        if return_padded:
            # Lane-padded slab: avoids an extra (M, Npad)->(M, N) HBM copy when
            # the consumer can handle the zero-padded tail.
            return y.reshape(*lead, y.shape[-1])
        y = y[:, :self.out_channels]
        return y.reshape(*lead, self.out_channels)


def _reference(x, wts, bs, out_channels):
    """Pure-JAX reference using the same (bf16-quantized) weights, f32 math."""
    h = x.reshape(-1, x.shape[-1]).astype(jnp.float32)
    for w, b in zip(wts, bs):
        h = jnp.maximum(h @ w.astype(jnp.float32) + b, 0.0)
    return h[:, :out_channels].reshape(*x.shape[:-1], out_channels)


if __name__ == "__main__":
    key = jax.random.PRNGKey(0)
    key, kx1, kx2 = jax.random.split(key, 3)

    # Small shapes consistent with the module's (batch, features) forward.
    batch, in_c, h_c, out_c = 16, 64, 128, 64
    model = MLP1D(key, num_layers=2, in_channels=in_c,
                  h_channels=h_c, out_channels=out_c)

    # Check 1: even batch (exact row tiles).
    x1 = jax.random.normal(kx1, (batch, in_c), jnp.float32)
    y1 = jax.block_until_ready(model(x1))
    r1 = _reference(x1, model._wts, model._bs, out_c)
    assert y1.shape == (batch, out_c)
    assert jnp.allclose(y1, r1, atol=2e-2, rtol=2e-2), "mismatch vs reference (even M)"

    # Check 2: awkward batch (exercises the padded last row block of the cdiv grid).
    x2 = jax.random.normal(kx2, (532, in_c), jnp.float32)
    y2 = jax.block_until_ready(model(x2))
    r2 = _reference(x2, model._wts, model._bs, out_c)
    assert y2.shape == (532, out_c)
    assert jnp.allclose(y2, r2, atol=2e-2, rtol=2e-2), "mismatch vs reference (odd M)"

    print("KERNEL_OK")
</pallas_src>

<mosaic_0001>
module attributes {stable_mosaic.version = 11 : i64} {
  func.func @_fused_mlp_kernel(%arg0: i32, %arg1: memref<8x64xf32, #tpu.memory_space<vmem>>, %arg2: memref<64x128xbf16, #tpu.memory_space<vmem>>, %arg3: memref<1x128xf32, #tpu.memory_space<vmem>>, %arg4: memref<128x128xbf16, #tpu.memory_space<vmem>>, %arg5: memref<1x128xf32, #tpu.memory_space<vmem>>, %arg6: memref<8x128xf32, #tpu.memory_space<vmem>>) attributes {dimension_semantics = [#tpu.dimension_semantics<parallel>], iteration_bounds = array<i64: 2>, scalar_prefetch = 0 : i64, scratch_operands = 0 : i64, tpu.core_type = #tpu.core_type<tc>, window_params = [{transform_indices = @transform_0, window_bounds = array<i64: 8, 64>}, {pipeline_mode = #tpu.pipeline_mode<synchronous>, transform_indices = @transform_1, window_bounds = array<i64: 64, 128>}, {pipeline_mode = #tpu.pipeline_mode<synchronous>, transform_indices = @transform_2, window_bounds = array<i64: 1, 128>}, {pipeline_mode = #tpu.pipeline_mode<synchronous>, transform_indices = @transform_3, window_bounds = array<i64: 128, 128>}, {pipeline_mode = #tpu.pipeline_mode<synchronous>, transform_indices = @transform_4, window_bounds = array<i64: 1, 128>}, {transform_indices = @transform_5, window_bounds = array<i64: 8, 128>}]} {
    %c0 = arith.constant 0 : index
    %c0_0 = arith.constant 0 : index
    %0 = vector.load %arg1[%c0, %c0_0] : memref<8x64xf32, #tpu.memory_space<vmem>>, vector<8x64xf32>
    %c0_1 = arith.constant 0 : index
    %c0_2 = arith.constant 0 : index
    %1 = vector.load %arg2[%c0_1, %c0_2] : memref<64x128xbf16, #tpu.memory_space<vmem>>, vector<64x128xbf16>
    %c0_3 = arith.constant 0 : index
    %c0_4 = arith.constant 0 : index
    %2 = vector.load %arg3[%c0_3, %c0_4] : memref<1x128xf32, #tpu.memory_space<vmem>>, vector<1x128xf32>
    %3 = arith.truncf %0 : vector<8x64xf32> to vector<8x64xbf16>
    %cst = arith.constant dense<0.000000e+00> : vector<8x128xf32>
    %4 = tpu.matmul %3, %1, %cst {dimension_numbers = #tpu.dot_dimension_numbers<[1], [0], [0], [1], [0, 0, 1, 1], [], []>} : vector<8x64xbf16>, vector<64x128xbf16>, vector<8x128xf32> -> vector<8x128xf32>
    %5 = vector.broadcast %2 : vector<1x128xf32> to vector<8x128xf32>
    %6 = arith.addf %4, %5 : vector<8x128xf32>
    %cst_5 = arith.constant 0.000000e+00 : f32
    %7 = vector.broadcast %cst_5 : f32 to vector<8x128xf32>
    %8 = arith.maximumf %6, %7 : vector<8x128xf32>
    %c0_6 = arith.constant 0 : index
    %c0_7 = arith.constant 0 : index
    %9 = vector.load %arg4[%c0_6, %c0_7] : memref<128x128xbf16, #tpu.memory_space<vmem>>, vector<128x128xbf16>
    %c0_8 = arith.constant 0 : index
    %c0_9 = arith.constant 0 : index
    %10 = vector.load %arg5[%c0_8, %c0_9] : memref<1x128xf32, #tpu.memory_space<vmem>>, vector<1x128xf32>
    %11 = arith.truncf %8 : vector<8x128xf32> to vector<8x128xbf16>
    %cst_10 = arith.constant dense<0.000000e+00> : vector<8x128xf32>
    %12 = tpu.matmul %11, %9, %cst_10 {dimension_numbers = #tpu.dot_dimension_numbers<[1], [0], [0], [1], [0, 0, 1, 1], [], []>} : vector<8x128xbf16>, vector<128x128xbf16>, vector<8x128xf32> -> vector<8x128xf32>
    %13 = vector.broadcast %10 : vector<1x128xf32> to vector<8x128xf32>
    %14 = arith.addf %12, %13 : vector<8x128xf32>
    %cst_11 = arith.constant 0.000000e+00 : f32
    %15 = vector.broadcast %cst_11 : f32 to vector<8x128xf32>
    %16 = arith.maximumf %14, %15 : vector<8x128xf32>
    %c0_12 = arith.constant 0 : index
    %c0_13 = arith.constant 0 : index
    %17 = vector.load %arg6[%c0_12, %c0_13] : memref<8x128xf32, #tpu.memory_space<vmem>>, vector<8x128xf32>
    tpu.vector_store %arg6[%c0_12, %c0_13], %16 {strides = array<i32>} : memref<8x128xf32, #tpu.memory_space<vmem>>, vector<8x128xf32>,
    return
  }
  func.func @transform_0(%arg0: i32) -> (i32, i32) {
    %c0_i32 = arith.constant 0 : i32
    %c0_i32_0 = arith.constant 0 : i32
    return %arg0, %c0_i32 : i32, i32
  }
  func.func @transform_1(%arg0: i32) -> (i32, i32) {
    %c0_i32 = arith.constant 0 : i32
    %c0_i32_0 = arith.constant 0 : i32
    %c0_i32_1 = arith.constant 0 : i32
    return %c0_i32, %c0_i32_0 : i32, i32
  }
  func.func @transform_2(%arg0: i32) -> (i32, i32) {
    %c0_i32 = arith.constant 0 : i32
    %c0_i32_0 = arith.constant 0 : i32
    %c0_i32_1 = arith.constant 0 : i32
    return %c0_i32, %c0_i32_0 : i32, i32
  }
  func.func @transform_3(%arg0: i32) -> (i32, i32) {
    %c0_i32 = arith.constant 0 : i32
    %c0_i32_0 = arith.constant 0 : i32
    %c0_i32_1 = arith.constant 0 : i32
    return %c0_i32, %c0_i32_0 : i32, i32
  }
  func.func @transform_4(%arg0: i32) -> (i32, i32) {
    %c0_i32 = arith.constant 0 : i32
    %c0_i32_0 = arith.constant 0 : i32
    %c0_i32_1 = arith.constant 0 : i32
    return %c0_i32, %c0_i32_0 : i32, i32
  }
  func.func @transform_5(%arg0: i32) -> (i32, i32) {
    %c0_i32 = arith.constant 0 : i32
    %c0_i32_0 = arith.constant 0 : i32
    return %arg0, %c0_i32 : i32, i32
  }
}

</mosaic_0001>

<bundles_post_ra>
// kernel: fused_mlp.1
= control target key start
LH: loop header
LB: loop body
LE: loop exit
PB: predicated region body
PF: predicated region fallthrough
CT: control target
= control target key end

     0   :  { %10 = vsyncpa [#allocation3], 0  ;;  %s1168_s0 = inlined_call_operand.hbm [shape: f32[16,64], index: 0, kind: input, shape index: {}]   ;;  %s1169_s1 = inlined_call_operand.hbm [shape: bf16[64,128], index: 1, kind: input, shape index: {}]   ;;  %s1170_s2 = inlined_call_operand.vmem [shape: f32[1,128], index: 2, kind: input, shape index: {}]   ;;  %s1171_s3 = inlined_call_operand.hbm [shape: bf16[128,128], index: 3, kind: input, shape index: {}]   ;;  %s1172_s4 = inlined_call_operand.vmem [shape: f32[1,128], index: 4, kind: input, shape index: {}]   ;;  %s1173_s5 = inlined_call_operand.hbm [shape: f32[16,128], index: 5, kind: output, shape index: {}]  }
   0x1   :  { %12 = vsyncpa [#allocation3 + $0x1], 0 }
   0x2   :  { %13 = vsyncpa [#allocation6], 0 }
   0x3   :  { %14 = vsyncpa [#allocation4], 0 }
   0x4   :  { %16 = vsyncpa [#allocation4 + $0x1], 0  ;;  %s929_s18 = smov 0   ;;  %s931_s19 = smov 0  }
   0x5   :  { %s933_s20 = smov 0   ;;  %s935_s21 = smov 0  }
   0x6 LB: > { %s950_s22 = sadd.s32 4294967295, %s889_s21   ;;  %s573_s23 = sadd.s32 4294967294, %s889_s21   ;;  %s889_s21 = sphi %s935_s21, %s1193_s21   ;;  %s885_s20 = sphi %s933_s20, %s1192_s20   ;;  %s881_s19 = sphi %s931_s19, %s1191_s19   ;;  %s877_s18 = sphi %s929_s18, %s1190_s18  }
   0x7   : > { %p42_p0 = scmp.ne.s32.totalorder %s881_s19, %s877_s18  ;;  %p1174_p1 = scmp.eq.s32.totalorder %s950_s22, 0 }
   0x8   : > { %p156_p3 = scmp.eq.s32.totalorder %s573_s23, 1  ;;  %p574_p5 = scmp.ge.s32.totalorder %s889_s21, 1 }
   0x9   : > { %p959_p4 = por %p1174_p1, %p42_p0  ;;  %p163_p7 = scmp.lt.s32.totalorder %s889_s21, 3 }
   0xa   : > { %p964_p6 = por %p156_p3, %p42_p0  ;;  %s891_s27 = smov [#allocation5]  }
   0xb   : > { %s1177_s24 = scalar_select %p959_p4, 1, 0 }
   0xc   : > { %s1178_s25 = scalar_select %p964_p6, 1, 0 }
   0xd   : > { %p969_p8 = pnand %p574_p5, %p163_p7  ;;  %s175_s28 = sshll.u32 %s891_s27, 4  ;;  %s973_s28 = int_to_ptr.vmem [resolvable:$true] %s175_s28 }
   0xe   : > { %s892_s30 = smov [#allocation7]   ;;  %s733_s9 = scalar_lea.hbm %s1169_s1, 512 }
   0xf   : > { %p662_p9 = pneg %p969_p8  ;;  %s191_s6 = sshll.u32 %s892_s30, 4  ;;  %s984_s6 = int_to_ptr.vmem [resolvable:$true] %s191_s6 }
  0x10   : > { %p734_p12 = scmp.ne.s32.totalorder %s1169_s1, %s733_s9  ;;  %p740_p5 = scmp.lt.u32.totalorder %s733_s9, %s1169_s1 }
  0x11   : > { %p980_p11 = pnand %p662_p9, %p1174_p1 }
  0x13   : > { %p735_p13 = pneg %p980_p11 }
  0x15   : > { %p736_p0 = pnand %p735_p13, %p734_p12 }
  0x17   : > { %p737_p3 = pneg %p736_p0 }
  0x19   : > { %p742_p7 = pnand %p740_p5, %p737_p3 }
  0x1b   : > { %745 = shalt.err (!%p742_p7)
}
  0x1c   : > { %s746_s14 = scalar_lea.vmem %s973_s28, 512  ;;  %p754_p2 = scmp.lt.s32.totalorder %s973_s28, %s973_s28 }
  0x1d   : > { %p747_p9 = scmp.ne.s32.totalorder %s973_s28, %s746_s14  ;;  %p755_p12 = scmp.lt.s32.totalorder %s746_s14, %s746_s14 }
  0x1f   : > { %p749_p10 = pnand %p747_p9, %p735_p13  ;;  %p756_p0 = por %p755_p12, %p754_p2 }
  0x21   : > { %p750_p1 = pneg %p749_p10 }
  0x23   : > { %p757_p6 = pnand %p756_p0, %p750_p1 }
  0x25   : > { %760 = shalt.err (!%p757_p6)
}
  0x26   : > { %s893_s15 = smov 64   ;;  %s894_s16 = smov 4  }
  0x27   : > { %665 = dma.hbm_to_vmem [thread:$0]  (!%p980_p11), %s1169_s1, 512, %s973_s28, [#allocation6], %s893_s15, %s893_s15, %s894_s16  }
  0x28   : > { %s761_s7 = scalar_lea.hbm %s1171_s3, 1024 }
  0x29   : > { %p762_p2 = scmp.ne.s32.totalorder %s1171_s3, %s761_s7  ;;  %p768_p10 = scmp.lt.u32.totalorder %s761_s7, %s1171_s3 }
  0x2b   : > { %p764_p1 = pnand %p762_p2, %p735_p13 }
  0x2d   : > { %p765_p6 = pneg %p764_p1 }
  0x2f   : > { %p770_p3 = pnand %p768_p10, %p765_p6 }
  0x31   : > { %773 = shalt.err (!%p770_p3)
}
  0x32   : > { %s774_s28 = scalar_lea.vmem %s984_s6, 1024  ;;  %p782_p12 = scmp.lt.s32.totalorder %s984_s6, %s984_s6 }
  0x33   : > { %p775_p5 = scmp.ne.s32.totalorder %s984_s6, %s774_s28  ;;  %p783_p0 = scmp.lt.s32.totalorder %s774_s28, %s774_s28 }
  0x35   : > { %p777_p7 = pnand %p775_p5, %p735_p13  ;;  %p784_p2 = por %p783_p0, %p782_p12 }
  0x37   : > { %p778_p9 = pneg %p777_p7 }
  0x39   : > { %p785_p1 = pnand %p784_p2, %p778_p9 }
  0x3b   : > { %788 = shalt.err (!%p785_p1)
}
  0x3c   : > { %668 = dma.hbm_to_vmem [thread:$0]  (!%p980_p11), %s1171_s3, 1024, %s984_s6, [#allocation6], %s893_s15, %s893_s15, %s894_s16  }
  0x3d   : > { %s1039_s14 = sadd.s32 1, %s889_s21   ;;  %s29_s29 = sadd.s32 1, %s885_s20 }
  0x3e   : > { %s26_s17 = ssub.s32 %s889_s21, %s1039_s14  ;;  %p36_p13 = scmp.ne.s32.totalorder %s885_s20, %s881_s19 }
  0x3f   : > { %p27_p6 = scmp.eq.s32.totalorder %s26_s17, 0  ;;  %p37_p10 = scmp.eq.s32.totalorder %s889_s21, 0 }
  0x40   : > { %p1181_p3 = scmp.eq.s32.totalorder %s950_s22, 1  ;;  %p679_p7 = scmp.lt.s32.totalorder %s889_s21, 2 }
  0x41   : > { %s1055_s27 = scalar_select %p27_p6, %s885_s20, %s29_s29  }
  0x42   : > { %p1049_p5 = por %p1181_p3, %p36_p13  ;;  %p38_p9 = por %p37_p10, %p36_p13 }
  0x43   : > { %s208_s30 = sand.u32 1, %s885_s20   ;;  %s579_s6 = sshll.u32 %s889_s21, 7 }
  0x44   : > { %s1182_s23 = scalar_select %p1049_p5, 1, 0 }
  0x45   : > { %s578_s7 = sshll.u32 %s208_s30, 3  ;;  %s1062_s8 = scalar_lea.hbm %s1168_s0, %s579_s6 }
  0x46   : > { %s212_s9 = scalar_lea.vmem [#allocation2], %s578_s7  ;;  %p1066_p11 = pnand %p679_p7, %p38_p9 }
  0x47   : > { %s219_s10 = sshll.u32 %s212_s9, 4  ;;  %s209_s28 = scalar_lea.sflag [#allocation3], %s208_s30  ;;  %s1064_s10 = int_to_ptr.vmem [resolvable:$true] %s219_s10 }
  0x48   : > { %s789_s12 = scalar_lea.hbm %s1062_s8, 128  ;;  %p791_p0 = pneg %p1066_p11 }
  0x49   : > { %p790_p12 = scmp.ne.s32.totalorder %s1062_s8, %s789_s12  ;;  %s794_s17 = scalar_lea.hbm %s1168_s0, 256 }
  0x4a   : > { %p795_p13 = scmp.lt.u32.totalorder %s1062_s8, %s1168_s0  ;;  %p796_p6 = scmp.lt.u32.totalorder %s794_s17, %s789_s12 }
  0x4b   : > { %p792_p2 = pnand %p791_p0, %p790_p12  ;;  %p798_p3 = scmp.lt.u32.totalorder %s789_s12, %s1062_s8 }
  0x4c   : > { %p797_p10 = por %p796_p6, %p795_p13 }
  0x4d   : > { %p793_p1 = pneg %p792_p2 }
  0x4e   : > { %p799_p7 = por %p798_p3, %p797_p10 }
  0x50   : > { %p800_p9 = pnand %p799_p7, %p793_p1 }
  0x52   : > { %803 = shalt.err (!%p800_p9)
}
  0x53   : > { %s804_s30 = scalar_lea.vmem %s1064_s10, 128  ;;  %s895_s15 = smov [#allocation2]  }
  0x54   : > { %p805_p12 = scmp.ne.s32.totalorder %s1064_s10, %s804_s30  ;;  %s809_s16 = sshll.u32 %s895_s15, 4  ;;  %s810_s16 = int_to_ptr.vmem [resolvable:$false] %s809_s16 }
  0x55   : > { %s811_s9 = scalar_lea.vmem %s810_s16, 256  ;;  %p812_p4 = scmp.lt.s32.totalorder %s1064_s10, %s810_s16 }
  0x56   : > { %p807_p2 = pnand %p805_p12, %p791_p0  ;;  %p813_p13 = scmp.lt.s32.totalorder %s811_s9, %s804_s30 }
  0x58   : > { %p808_p5 = pneg %p807_p2  ;;  %p814_p6 = por %p813_p13, %p812_p4 }
  0x5a   : > { %p815_p10 = pnand %p814_p6, %p808_p5 }
  0x5c   : > { %818 = shalt.err (!%p815_p10)
}
  0x5d   : > { %672 = dma.hbm_to_vmem [thread:$0]  (!%p1066_p11), %s1062_s8, 128, %s1064_s10, %s209_s28  }
  0x5e   : > { %228 = sbr.rel (%p969_p8) target bundleno = 571 (0x23b), region = 40  ;;  %s1098_s12 = sand.u32 (!%p969_p8), 1, %s881_s19  }
  0x5f   : > { %s581_s13 = sshll.u32 (!%p969_p8), %s1098_s12, 3  ;;  %s231_s29 = scalar_lea.sflag (!%p969_p8), [#allocation3], %s1098_s12 }
  0x60   : > { %s234_s17 = scalar_lea.vmem (!%p969_p8), [#allocation2], %s581_s13  ;;  %p1184_p4 = scmp.ne.s32.totalorder (!%p969_p8), %s1177_s24, 0 }
  0x65   : > { %864 = dma.done.wait (%p1184_p4), %s231_s29, 128  }
  0x66   : > { %866 = vsyncadd (%p1184_p4), %s231_s29, 4294967168  ;;  %p1185_p5 = scmp.eq.s32.totalorder %s950_s22, 0 }
  0x68   : > { %868 = dma.done.wait (%p1185_p5), [#allocation6], 1536   ;;  %p1186_p8 = pmov %p1185_p5 }
  0x69   : > { %v896_v0 = vmov 0.0   ;;  %vm897_vm0 = vmmov 0   ;;  %v721_v1 = vld [vmem:[#allocation5] sm:$0xff]   ;;  %v722_v2 = vld [vmem:[#allocation5 + $0x8] sm:$0xff]   ;;  %v723_v4 = vld [vmem:[#allocation5 + $0x10] sm:$0xff]   ;;  %vm311_vm1 = vcmask 523264  }
  0x6a   : > { %870 = vsyncadd (%p1186_p8), [#allocation6], 4294965760  ;;  %618 = vmatprep.subr.bf16.mxu0 %v896_v0  ;;  %626 = vmatprep.mubr.msk.bf16.mxu0 %vm897_vm0, %v896_v0  ;;  %v725_v3 = vld [vmem:[#allocation7] sm:$0xff]   ;;  %v726_v5 = vld [vmem:[#allocation7 + $0x8] sm:$0xff]   ;;  %s601_s11 = sshll.u32 %s950_s22, 7  ;;  %s268_s28 = scalar_lea.vmem [#allocation8], %s581_s13 }
  0x6b   : > { %630 = vmatprep.subr.bf16.mxu1 %v896_v0  ;;  %646 = vmatprep.mubr.msk.bf16.mxu1 %vm897_vm0, %v896_v0  ;;  %v724_v6 = vld [vmem:[#allocation5 + $0x18] sm:$0xff]   ;;  %v727_v8 = vld [vmem:[#allocation7 + $0x10] sm:$0xff]   ;;  %v729_v11 = vld [vmem:[#allocation7 + $0x20] sm:$0xff]   ;;  %s484_s7 = sshll.u32 %s268_s28, 4  ;;  %s1124_s15 = scalar_lea.hbm %s1173_s5, %s601_s11  ;;  %s1126_s7 = int_to_ptr.vmem [resolvable:$true] %s484_s7 }
  0x6c   : > { %619 = vmatpush3.bf16.msra.mxu0 %v721_v1  ;;  %631 = vmatpush3.bf16.msra.mxu1 %v725_v3  ;;  %v270_v7 = vld [vmem:[%s234_s17] sm:$0xff]  ;;  %v730_v12 = vld [vmem:[#allocation7 + $0x28] sm:$0xff]   ;;  %s471_s22 = scalar_lea.sflag [#allocation4], %s1098_s12  ;;  %s819_s16 = scalar_lea.vmem %s1126_s7, 128 }
  0x6d   : > { %620 = vmatprep.subr.bf16.mxu0 %v896_v0  ;;  %632 = vmatprep.subr.bf16.mxu1 %v896_v0  ;;  %v280_v9 = vpack.c.bf16 %v270_v7, %v270_v7  ;;  %v728_v10 = vld [vmem:[#allocation7 + $0x18] sm:$0xff]   ;;  %v731_v13 = vld [vmem:[#allocation7 + $0x30] sm:$0xff]   ;;  %p820_p11 = scmp.ne.s32.totalorder %s1126_s7, %s819_s16  ;;  %p1187_p0 = scmp.ne.s32.totalorder %s1182_s23, 0 }
  0x6e   : > { %v732_v14 = vld [vmem:[#allocation7 + $0x38] sm:$0xff]   ;;  %v585_v15 = vld [vmem:[%s1170_s2] ss:$0 sm:$0xff]  ;;  %s898_s9 = smov [#allocation8]  }
  0x6f   : > { %v591_v23 = vld [vmem:[%s1172_s4] ss:$0 sm:$0xff]  ;;  %p821_p1 = pnand %p820_p11, %p1187_p0  ;;  %s823_s13 = sshll.u32 %s898_s9, 4  ;;  %s824_s13 = int_to_ptr.vmem [resolvable:$false] %s823_s13 }
  0x70   : > { %621 = vmatpush3.bf16.msra.mxu0 %v722_v2  ;;  %633 = vmatpush3.bf16.msra.mxu1 %v726_v5  ;;  %s825_s29 = scalar_lea.vmem %s824_s13, 256  ;;  %p826_p7 = scmp.lt.s32.totalorder %s1126_s7, %s824_s13 }
  0x71   : > { %622 = vmatprep.subr.bf16.mxu0 %v896_v0  ;;  %634 = vmatprep.subr.bf16.mxu1 %v896_v0  ;;  %p822_p3 = pneg %p821_p1  ;;  %p827_p9 = scmp.lt.s32.totalorder %s825_s29, %s819_s16 }
  0x73   : > { %p828_p12 = por %p827_p9, %p826_p7 }
  0x74   : > { %623 = vmatpush3.bf16.msra.mxu0 %v723_v4  ;;  %635 = vmatpush3.bf16.msra.mxu1 %v727_v8 }
  0x75   : > { %624 = vmatprep.subr.bf16.mxu0 %v896_v0  ;;  %636 = vmatprep.subr.bf16.mxu1 %v896_v0  ;;  %p829_p2 = pnand %p828_p12, %p822_p3 }
  0x78   : > { %625 = vmatpush3.bf16.msra.mxu0 %v724_v6  ;;  %637 = vmatpush3.bf16.msra.mxu1 %v728_v10 }
  0x79   : > { %638 = vmatprep.subr.bf16.mxu1 %v896_v0 }
  0x7b   : > { %627 = vmatmul.mubr.msk.bf16.vlgmr.msra.gmra.mrb[0].mxu0 %vm311_vm1, %v280_v9 }
  0x7c   : > { %639 = vmatpush3.bf16.msra.mxu1 %v729_v11 }
  0x7d   : > { %640 = vmatprep.subr.bf16.mxu1 %v896_v0 }
  0x80   : > { %641 = vmatpush3.bf16.msra.mxu1 %v730_v12 }
  0x81   : > { %642 = vmatprep.subr.bf16.mxu1 %v896_v0 }
  0x84   : > { %643 = vmatpush3.bf16.msra.mxu1 %v731_v13 }
  0x85   : > { %644 = vmatprep.subr.bf16.mxu1 %v896_v0 }
  0x88   : > { %645 = vmatpush3.bf16.msra.mxu1 %v732_v14 }
 0x14e   : > { %v349_v16 = vpop.f32.mrb[0].mxu0 }
 0x14f   : > { %v350_v17 = vadd.f32 %v585_v15, %v349_v16  ;;  %v628_v18 = vpop.f32.mrb[1].mxu0 }
 0x150   : > { %v352_v19 = vpop.f32.mrb[2].mxu0 }
 0x151   : > { %v355_v20 = vmax.f32 %v350_v17, 0.0  ;;  %v629_v21 = vpop.f32.mrb[3].mxu0 }
 0x153   : > { %v373_v22 = vpack.c.bf16 %v355_v20, %v355_v20 }
 0x155   : > { %647 = vmatmul.mubr.bf16.vlgmr.msra.gmra.mrb[0].mxu1 %v373_v22 }
 0x228   : > { %v462_v24 = vpop.f32.mrb[0].mxu1 }
 0x229   : > { %v463_v25 = vadd.f32 %v591_v23, %v462_v24  ;;  %v648_v26 = vpop.f32.mrb[1].mxu1 }
 0x22a   : > { %v465_v27 = vpop.f32.mrb[2].mxu1 }
 0x22b   : > { %v468_v28 = vmax.f32 %v463_v25, 0.0  ;;  %v649_v29 = vpop.f32.mrb[3].mxu1 }
 0x22d   : > { %469 = vst [vmem:[%s268_s28] sm:$0xff] %v468_v28 }
 0x22e   : > { %832 = shalt.err (!%p829_p2)
}
 0x22f   : > { %s833_s12 = scalar_lea.hbm %s1124_s15, 128  ;;  %s837_s26 = scalar_lea.hbm %s1173_s5, 256 }
 0x230   : > { %p834_p13 = scmp.ne.s32.totalorder %s1124_s15, %s833_s12  ;;  %p838_p4 = scmp.lt.u32.totalorder %s1124_s15, %s1173_s5 }
 0x231   : > { %p839_p5 = scmp.lt.u32.totalorder %s837_s26, %s833_s12  ;;  %p841_p11 = scmp.lt.u32.totalorder %s833_s12, %s1124_s15 }
 0x232   : > { %p835_p6 = pnand %p834_p13, %p1187_p0 }
 0x233   : > { %p840_p8 = por %p839_p5, %p838_p4 }
 0x234   : > { %p836_p10 = pneg %p835_p6 }
 0x235   : > { %p842_p1 = por %p841_p11, %p840_p8 }
 0x237   : > { %p843_p3 = pnand %p842_p1, %p836_p10 }
 0x239   : > { %846 = shalt.err (!%p843_p3)
}
 0x23a   : > { %660 = dma.vmem_to_hbm [thread:$0]  (%p1187_p0), %s1126_s7, 128, %s1124_s15, %s471_s22  }
 0x23b PF: > { %s496_s11 = sand.u32 1, %s877_s18   ;;  %p1188_p7 = scmp.ne.s32.totalorder %s1178_s25, 0 }
 0x23c   : > { %p1189_p9 = scmp.ge.s32.totalorder %s889_s21, 2  ;;  %s497_s28 = scalar_lea.sflag [#allocation4], %s496_s11 }
 0x23e   : > { %p674_p12 = pnand %p1189_p9, %p1188_p7 }
 0x240   : > { %872 = dma.done.wait (!%p674_p12), %s497_s28, 128  }
 0x241   : > { %874 = vsyncadd (!%p674_p12), %s497_s28, 4294967168  ;;  %p19_p2 = scmp.ge.s32.totalorder %s1039_s14, 4   ;;  %s1190_s18 = smov %s881_s19 }
 0x242   : > { %s1191_s19 = smov %s885_s20  ;;  %s1192_s20 = smov %s1055_s27 }
 0x243   : > { %s1193_s21 = smov %s1039_s14  ;;  %21 = sbr.rel (!%p19_p2) target bundleno = 6 (0x6), region = 93 }
 0x24a   :  { %502 = vsyncpa [#allocation3], 1 }
 0x24b   :  { %504 = vsyncpa [#allocation3 + $0x1], 1 }
 0x24c   :  { %505 = vsyncpa [#allocation6], 1 }
 0x24d   :  { %506 = vsyncpa [#allocation4], 1 }
 0x24e   :  { %508 = vsyncpa [#allocation4 + $0x1], 1 }

</bundles_post_ra>
